<compile_context>
chip_gen: v7x
topology: tpu7x:2x2x1
jax: 0.10.0
libtpu: 0.0.40
codegen_flags: <defaults>
</compile_context>

<pallas_src>
import math
import functools

import jax
import jax.numpy as jnp
from jax.experimental import pallas as pl
from jax.experimental.pallas import tpu as pltpu

EPS = 1e-10
LANE = 128
SUBLANE = 8
_TB_CAP = 2048          # raised from 256: amortize ~0.35 us/step grid overhead
_MIN_SPLIT_ROWS = 512   # only force >=2 grid steps when each tile stays >= this


def _round_up(x, m):
    return ((x + m - 1) // m) * m


def _vmem_limit_bytes():
    """Scoped VMEM limit: ~half of physical, capped at 64 MiB.

    v5e/v6e (128 MiB physical) -> 64 MiB (v5e's default scoped limit is only
    16 MiB, so raising it is the point there); v7x (64 MiB physical) -> 32 MiB.
    """
    try:
        phys = pltpu.get_tpu_info().vmem_capacity_bytes
    except Exception:
        phys = 64 * 1024 * 1024  # conservative fallback (assume v7x-sized VMEM)
    return int(min(64 * 1024 * 1024, max(32 * 1024 * 1024, phys // 2)))


def _pick_tb(B, in_dim, out_p, vmem_limit):
    """Largest sublane-rounded batch tile that fits the VMEM budget (<= _TB_CAP)."""
    # Per-row f32 bytes: double-buffered x tile (2*in_dim) + double-buffered
    # out tile (2*out_p) + log|x| (in_dim) + (tb, 2*out_p) push-1 result +
    # (tb, out_p) push-2 result + blend temporaries (~2*out_p).
    per_row_bytes = 4 * (3 * in_dim + 7 * out_p)
    # Resident packed [W^T|G^T] slab, budgeted at 2x (default double-buffering).
    fixed_bytes = 2 * (in_dim * 2 * out_p) * 4
    budget = int(vmem_limit * 0.75) - fixed_bytes
    tb = max(SUBLANE, budget // per_row_bytes)
    tb = min(tb, _TB_CAP, _round_up(B, SUBLANE))
    # Keep >= 2 grid steps for big batches so the "parallel" batch axis can
    # shard across v7x's 2 TensorCores (no-op on single-TC v5e/v6e).
    if B >= 2 * _MIN_SPLIT_ROWS:
        tb = min(tb, _round_up((B + 1) // 2, SUBLANE))
    return max(SUBLANE, (int(tb) // SUBLANE) * SUBLANE)


def _nalu_kernel(x_ref, wg_ref, o_ref):
    """One batch tile of the NALU forward.

    x_ref : (tb, in_dim)       f32 input tile
    wg_ref: (in_dim, 2*out_p)  f32 packed [W^T | G^T], out_dim zero-padded to out_p
    o_ref : (tb, out_p)        f32 lane-dense output tile
    """
    out_p = o_ref.shape[1]

    x = x_ref[...]                                   # (tb, in_dim)
    log_x = jnp.log(jnp.abs(x) + EPS)                # per-tile EUP work

    # MXU push 1: x @ [W^T | G^T] -> additive path + gate logits in one result.
    p1 = jnp.dot(x, wg_ref[...], preferred_element_type=jnp.float32)
    a = p1[:, :out_p]                                # x @ W^T
    g = jax.nn.sigmoid(p1[:, out_p:])                # sigmoid(x @ G^T)

    # MXU push 2: log|x| @ W^T against a static, lane-aligned slice of the
    # resident RHS. No sublane concat of the LHS, no dead log|x|@G^T quadrant.
    m = jnp.exp(jnp.dot(log_x, wg_ref[:, :out_p],
                        preferred_element_type=jnp.float32))

    # m + g*(a - m) == g*a + (1-g)*m, one fewer VPU multiply.
    o_ref[...] = m + g * (a - m)


def nalu_pack_weights(W_hat, M_hat, G):
    """Precompute the packed, lane-padded [W^T | G^T] slab: (in_dim, 2*out_p).

    For inference (fixed weights) call this once and reuse via
    nalu_forward_packed; nalu_forward recomputes it per call (training case).
    """
    out_dim, in_dim = W_hat.shape
    out_p = _round_up(out_dim, LANE)
    W = jnp.tanh(W_hat) * jax.nn.sigmoid(M_hat)      # grid-invariant, hoisted
    pad = ((0, out_p - out_dim), (0, 0))
    W_t = jnp.pad(W.astype(jnp.float32), pad).T      # (in_dim, out_p)
    G_t = jnp.pad(G.astype(jnp.float32), pad).T      # (in_dim, out_p)
    return jnp.concatenate([W_t, G_t], axis=1)       # (in_dim, 2*out_p)


def _nalu_pallas(x, wg_t, out_dim, tb):
    B, in_dim = x.shape
    out_p = wg_t.shape[1] // 2

    vmem_limit = _vmem_limit_bytes()
    if tb is None:
        tb = _pick_tb(B, in_dim, out_p, vmem_limit)
    tb = max(SUBLANE, (int(tb) // SUBLANE) * SUBLANE)

    # Ragged batches are padded, not asserted.
    B_p = _round_up(B, tb)
    x_p = jnp.pad(x, ((0, B_p - B), (0, 0))) if B_p != B else x
    grid = (B_p // tb,)

    cost = pl.CostEstimate(
        flops=6 * B_p * in_dim * out_p,                 # two MXU pushes
        transcendentals=B_p * (in_dim + 2 * out_p),     # log + sigmoid + exp
        bytes_accessed=4 * (B_p * in_dim + B_p * out_p + in_dim * 2 * out_p),
    )

    y_p = pl.pallas_call(
        _nalu_kernel,
        out_shape=jax.ShapeDtypeStruct((B_p, out_p), jnp.float32),
        grid_spec=pltpu.PrefetchScalarGridSpec(
            num_scalar_prefetch=0,
            grid=grid,
            in_specs=[
                pl.BlockSpec((tb, in_dim), lambda i: (i, 0)),          # x tile
                pl.BlockSpec((in_dim, 2 * out_p), lambda i: (0, 0)),   # [W^T|G^T], resident
            ],
            out_specs=pl.BlockSpec((tb, out_p), lambda i: (i, 0)),
        ),
        compiler_params=pltpu.CompilerParams(
            dimension_semantics=("parallel",),   # batch axis -> megacore / 2-TC
            vmem_limit_bytes=vmem_limit,
        ),
        cost_estimate=cost,
    )(x_p, wg_t)

    # Padded batch rows may hold exp-overflow garbage and padded out columns
    # hold 0.5; both are dead after this slice. Never reduce over y_p directly.
    return y_p[:B, :out_dim]


@functools.partial(jax.jit, static_argnames=("tb",))
def nalu_forward(x, W_hat, M_hat, G, *, tb=None):
    """x: (B, in_dim). W_hat, M_hat, G: (out_dim, in_dim). Returns (B, out_dim) f32."""
    wg_t = nalu_pack_weights(W_hat, M_hat, G)
    return _nalu_pallas(x.astype(jnp.float32), wg_t, W_hat.shape[0], tb)


@functools.partial(jax.jit, static_argnames=("out_dim", "tb"))
def nalu_forward_packed(x, wg_t, *, out_dim, tb=None):
    """Inference path: weights already packed once via nalu_pack_weights."""
    return _nalu_pallas(x.astype(jnp.float32), wg_t, out_dim, tb)


def _kaiming_uniform(key, shape, a=0.0):
    # Deterministic stand-in for torch.nn.init.kaiming_uniform_.
    fan_in = shape[1]
    gain = math.sqrt(2.0 / (1.0 + a * a))
    bound = gain * math.sqrt(3.0 / fan_in)
    return jax.random.uniform(key, shape, jnp.float32, -bound, bound)


def _nalu_reference(x, W_hat, M_hat, G):
    W = jnp.tanh(W_hat) * jax.nn.sigmoid(M_hat)
    a = x @ W.T
    g = jax.nn.sigmoid(x @ G.T)
    m = jnp.exp(jnp.log(jnp.abs(x) + EPS) @ W.T)
    return g * a + (1.0 - g) * m


if __name__ == "__main__":
    batch, in_dim, out_dim = 16, 32, 16

    key = jax.random.PRNGKey(0)
    k_x, k_w, k_m, k_g = jax.random.split(key, 4)

    x = jax.random.normal(k_x, (batch, in_dim), jnp.float32)
    W_hat = _kaiming_uniform(k_w, (out_dim, in_dim))
    M_hat = _kaiming_uniform(k_m, (out_dim, in_dim))
    G = _kaiming_uniform(k_g, (out_dim, in_dim), a=math.sqrt(5.0))

    y = jax.block_until_ready(nalu_forward(x, W_hat, M_hat, G))
    y_ref = _nalu_reference(x, W_hat, M_hat, G)
    assert y.shape == (batch, out_dim)
    assert jnp.allclose(y, y_ref, atol=1e-5, rtol=1e-5), "mismatch vs reference"

    # Exercise the precomputed-weights (inference) path as well.
    wg_t = jax.block_until_ready(nalu_pack_weights(W_hat, M_hat, G))
    y2 = jax.block_until_ready(nalu_forward_packed(x, wg_t, out_dim=out_dim))
    assert jnp.allclose(y2, y_ref, atol=1e-5, rtol=1e-5), "packed-path mismatch"

    print("KERNEL_OK")
</pallas_src>

<mosaic_0001>
module attributes {stable_mosaic.version = 11 : i64} {
  func.func @_nalu_kernel(%arg0: i32, %arg1: memref<16x32xf32, #tpu.memory_space<vmem>>, %arg2: memref<32x256xf32, #tpu.memory_space<vmem>>, %arg3: memref<16x128xf32, #tpu.memory_space<vmem>>) attributes {dimension_semantics = [#tpu.dimension_semantics<parallel>], iteration_bounds = array<i64: 1>, scalar_prefetch = 0 : i64, scratch_operands = 0 : i64, tpu.core_type = #tpu.core_type<tc>, window_params = [{transform_indices = @transform_0, window_bounds = array<i64: 16, 32>}, {pipeline_mode = #tpu.pipeline_mode<synchronous>, transform_indices = @transform_1, window_bounds = array<i64: 32, 256>}, {transform_indices = @transform_2, window_bounds = array<i64: 16, 128>}]} {
    %c0 = arith.constant 0 : index
    %c0_0 = arith.constant 0 : index
    %0 = vector.load %arg1[%c0, %c0_0] : memref<16x32xf32, #tpu.memory_space<vmem>>, vector<16x32xf32>
    %1 = math.absf %0 : vector<16x32xf32>
    %cst = arith.constant 1.000000e-10 : f32
    %2 = vector.broadcast %cst : f32 to vector<16x32xf32>
    %3 = arith.addf %1, %2 : vector<16x32xf32>
    %4 = math.log %3 : vector<16x32xf32>
    %c0_1 = arith.constant 0 : index
    %c0_2 = arith.constant 0 : index
    %5 = vector.load %arg2[%c0_1, %c0_2] : memref<32x256xf32, #tpu.memory_space<vmem>>, vector<32x256xf32>
    %cst_3 = arith.constant dense<0.000000e+00> : vector<16x256xf32>
    %6 = tpu.matmul %0, %5, %cst_3 {dimension_numbers = #tpu.dot_dimension_numbers<[1], [0], [0], [1], [0, 0, 1, 1], [], []>} : vector<16x32xf32>, vector<32x256xf32>, vector<16x256xf32> -> vector<16x256xf32>
    %7 = vector.extract_strided_slice %6 {offsets = [0, 0], sizes = [16, 128], strides = [1, 1]} : vector<16x256xf32> to vector<16x128xf32>
    %8 = vector.extract_strided_slice %6 {offsets = [0, 128], sizes = [16, 128], strides = [1, 1]} : vector<16x256xf32> to vector<16x128xf32>
    %9 = arith.negf %8 : vector<16x128xf32>
    %10 = math.exp %9 : vector<16x128xf32>
    %cst_4 = arith.constant 1.000000e+00 : f32
    %11 = vector.broadcast %cst_4 : f32 to vector<16x128xf32>
    %12 = arith.addf %11, %10 : vector<16x128xf32>
    %13 = arith.divf %11, %12 : vector<16x128xf32>
    %c0_5 = arith.constant 0 : index
    %c0_6 = arith.constant 0 : index
    %14 = vector.load %arg2[%c0_5, %c0_6] : memref<32x256xf32, #tpu.memory_space<vmem>>, vector<32x128xf32>
    %cst_7 = arith.constant dense<0.000000e+00> : vector<16x128xf32>
    %15 = tpu.matmul %4, %14, %cst_7 {dimension_numbers = #tpu.dot_dimension_numbers<[1], [0], [0], [1], [0, 0, 1, 1], [], []>} : vector<16x32xf32>, vector<32x128xf32>, vector<16x128xf32> -> vector<16x128xf32>
    %16 = math.exp %15 : vector<16x128xf32>
    %17 = arith.subf %7, %16 : vector<16x128xf32>
    %18 = arith.mulf %13, %17 : vector<16x128xf32>
    %19 = arith.addf %16, %18 : vector<16x128xf32>
    %c0_8 = arith.constant 0 : index
    %c0_9 = arith.constant 0 : index
    %20 = vector.load %arg3[%c0_8, %c0_9] : memref<16x128xf32, #tpu.memory_space<vmem>>, vector<16x128xf32>
    tpu.vector_store %arg3[%c0_8, %c0_9], %19 {strides = array<i32>} : memref<16x128xf32, #tpu.memory_space<vmem>>, vector<16x128xf32>,
    return
  }
  func.func @transform_0(%arg0: i32) -> (i32, i32) {
    %c0_i32 = arith.constant 0 : i32
    %c0_i32_0 = arith.constant 0 : i32
    return %arg0, %c0_i32 : i32, i32
  }
  func.func @transform_1(%arg0: i32) -> (i32, i32) {
    %c0_i32 = arith.constant 0 : i32
    %c0_i32_0 = arith.constant 0 : i32
    %c0_i32_1 = arith.constant 0 : i32
    return %c0_i32, %c0_i32_0 : i32, i32
  }
  func.func @transform_2(%arg0: i32) -> (i32, i32) {
    %c0_i32 = arith.constant 0 : i32
    %c0_i32_0 = arith.constant 0 : i32
    return %arg0, %c0_i32 : i32, i32
  }
}

</mosaic_0001>

<bundles_post_ra>
// kernel: nalu_forward.1
= control target key start
LH: loop header
LB: loop body
LE: loop exit
PB: predicated region body
PF: predicated region fallthrough
CT: control target
= control target key end

     0   :  { %v322_v7 = vmov 0.0   ;;  %s383_s0 = inlined_call_operand.vmem [shape: f32[16,32], index: 0, kind: input, shape index: {}]   ;;  %s384_s1 = inlined_call_operand.vmem [shape: f32[32,256], index: 1, kind: input, shape index: {}]   ;;  %s385_s2 = inlined_call_operand.hbm [shape: f32[16,128], index: 2, kind: output, shape index: {}]  }
   0x1   :  { %v23_v0 = vld [vmem:[%s384_s1 + $0x8] sm:$0xff]  ;;  %v25_v1 = vld [vmem:[%s384_s1 + $0x18] sm:$0xff]  ;;  %v22_v2 = vld [vmem:[%s384_s1] sm:$0xff]  ;;  %101 = vmatprep.mubr.f32.mxu0 %v322_v7 }
   0x2   :  { %v262_v3 = vpack.c.bf16 %v25_v1, %v23_v0  ;;  %v24_v4 = vld [vmem:[%s384_s1 + $0x10] sm:$0xff]  ;;  %v27_v5 = vld [vmem:[%s384_s1 + $0x28] sm:$0xff]  ;;  %v29_v6 = vld [vmem:[%s384_s1 + $0x38] sm:$0xff] }
   0x3   :  { %v264_v8 = vpack.c.bf16 %v24_v4, %v22_v2  ;;  %v266_v9 = vpack.c.bf16 %v29_v6, %v27_v5  ;;  %v26_v10 = vld [vmem:[%s384_s1 + $0x20] sm:$0xff]  ;;  %v28_v11 = vld [vmem:[%s384_s1 + $0x30] sm:$0xff]  ;;  %v13_v14 = vld [vmem:[%s383_s0 + $0x8] sm:$0xff] }
   0x4   :  { %v12_v12 = vld [vmem:[%s383_s0] sm:$0xff]  ;;  %263 = vmatprep.subr.bf16.mxu0 %v262_v3 }
   0x5   :  { %v14_v13 = vand.u32 2147483647, %v12_v12 }
   0x6   :  { %7 = vsyncpa [#allocation3], 0  ;;  %265 = vmatpush1.bf16.msra.mxu0 %v264_v8  ;;  %v268_v15 = vpack.c.bf16 %v28_v11, %v26_v10  ;;  %271 = vmatprep.subr.bf16.mxu1 %v264_v8  ;;  %v15_v16 = vand.u32 2147483647, %v13_v14  ;;  %vm30_vm0 = vcmask 261120   ;;  %s323_s0 = smov [#allocation2]  }
   0x7   :  { %267 = vmatprep.subr.bf16.mxu0 %v266_v9  ;;  %273 = vmatpush3.bf16.msra.mxu1 %v264_v8  ;;  %v16_v17 = vadd.f32 1e-10, %v14_v13  ;;  %s228_s1 = sshll.u32 %s323_s0, 4  ;;  %s229_s1 = int_to_ptr.vmem [resolvable:$true] %s228_s1 }
   0x8   :  { %v17_v18 = vadd.f32 1e-10, %v15_v16  ;;  %275 = vmatprep.subr.bf16.mxu1 %v268_v15  ;;  %s298_s29 = scalar_lea.vmem %s229_s1, 256  ;;  %p303_p1 = scmp.lt.s32.totalorder %s229_s1, %s229_s1 }
   0x9   :  { %282 = vlog2.f32 %v16_v17  ;;  %p299_p0 = scmp.ne.s32.totalorder %s229_s1, %s298_s29  ;;  %p304_p2 = scmp.lt.s32.totalorder %s298_s29, %s298_s29 }
   0xa   :  { %269 = vmatpush1.bf16.msra.mxu0 %v268_v15  ;;  %284 = vlog2.f32 %v17_v18 }
   0xb   :  { %277 = vmatpush3.bf16.msra.mxu1 %v268_v15  ;;  %p305_p3 = por %p304_p2, %p303_p1 }
   0xd   :  { %239 = vmatmul.mubr.msk.f32.vlgmr.msra.gmra.mrb[0].mxu0 %vm30_vm0, %v12_v12  ;;  %p306_p4 = pnand %p305_p3, %p299_p0 }
   0xe   :  { %107 = vmatprep.mubr.f32.mxu0 %v322_v7 }
  0x11   :  { %240 = vmatmul.mubr.msk.f32.gmra.mrb[2].mxu0 %vm30_vm0, %v13_v14 }
  0x13   :  { %v283_v19 = vpop.eup %282 }
  0x14   :  { %v285_v20 = vpop.eup %284  ;;  %v19_v21 = vmul.f32 0.6931472, %v283_v19 }
  0x15   :  { %v21_v22 = vmul.f32 0.6931472, %v285_v20 }
  0x16   :  { %259 = vmatprep.mubr.msk.f32.mxu1 %vm30_vm0, %v19_v21 }
  0x17   :  { %260 = vmatmul.mubr.msk.f32.vlgmr.msra.gmra.mrb[0].mxu1 %vm30_vm0, %v21_v22 }
  0xe0   :  { %v103_v23 = vpop.f32.mrb[0].mxu0 }
  0xe1   :  { %v105_v24 = vpop.f32.mrb[1].mxu0 }
  0xe2   :  { %v241_v25 = vmul.f32 -1.442695, %v105_v24 }
  0xe4   :  { %286 = vpow2.f32 %v241_v25  ;;  %v109_v26 = vpop.f32.mrb[2].mxu0 }
  0xe5   :  { %v111_v27 = vpop.f32.mrb[3].mxu0 }
  0xe6   :  { %v242_v28 = vmul.f32 -1.442695, %v111_v27 }
  0xe8   :  { %288 = vpow2.f32 %v242_v28 }
  0xea   :  { %v261_v29 = vpop.f32.mrb[0].mxu1 }
  0xeb   :  { %v213_v30 = vmul.f32 1.442695, %v261_v29  ;;  %v202_v31 = vpop.f32.mrb[1].mxu1 }
  0xec   :  { %v211_v32 = vmul.f32 1.442695, %v202_v31 }
  0xed   :  { %290 = vpow2.f32 %v213_v30 }
  0xee   :  { %v287_v33 = vpop.eup %286  ;;  %292 = vpow2.f32 %v211_v32 }
  0xef   :  { %v120_v34 = vadd.f32 1.0, %v287_v33 }
  0xf1   :  { %294 = vrcp.f32 %v120_v34 }
  0xf2   :  { %v289_v35 = vpop.eup %288 }
  0xf3   :  { %v121_v36 = vadd.f32 1.0, %v289_v35 }
  0xf5   :  { %296 = vrcp.f32 %v121_v36 }
  0xf7   :  { %v291_v37 = vpop.eup %290 }
  0xf8   :  { %v293_v38 = vpop.eup %292  ;;  %v216_v39 = vsub.f32 %v109_v26, %v291_v37 }
  0xf9   :  { %v215_v40 = vsub.f32 %v103_v23, %v293_v38 }
  0xfb   :  { %v295_v41 = vpop.eup %294 }
  0xfc   :  { %v217_v42 = vmul.f32 %v295_v41, %v215_v40 }
  0xfe   :  { %v219_v43 = vadd.f32 %v293_v38, %v217_v42 }
  0xff   :  { %v297_v44 = vpop.eup %296 }
 0x100   :  { %v218_v45 = vmul.f32 %v297_v44, %v216_v39  ;;  %221 = vst [vmem:[#allocation2] sm:$0xff] %v219_v43 }
 0x102   :  { %v220_v46 = vadd.f32 %v291_v37, %v218_v45 }
 0x104   :  { %222 = vst [vmem:[#allocation2 + $0x8] sm:$0xff] %v220_v46 }
 0x105   :  { %309 = shalt.err (!%p306_p4)
}
 0x106   :  { %s310_s4 = scalar_lea.hbm %s385_s2, 256 }
 0x107   :  { %p311_p5 = scmp.ne.s32.totalorder %s385_s2, %s310_s4  ;;  %p314_p6 = scmp.lt.u32.totalorder %s310_s4, %s385_s2 }
 0x109   :  { %p316_p7 = pnand %p314_p6, %p311_p5 }
 0x10b   :  { %319 = shalt.err (!%p316_p7)
}
 0x10c   :  { %s324_s9 = smov 128   ;;  %s325_s10 = smov 8  }
 0x10d   :  { %234 = dma.vmem_to_hbm [thread:$0]  %s229_s1, 256, %s385_s2, [#allocation3], %s324_s9, %s324_s9, %s325_s10  }
 0x10e   :  { %320 = dma.done.wait [#allocation3], 256  }
 0x10f   :  { %321 = vsyncadd [#allocation3], 4294967040 }
 0x110   :  { %238 = vsyncpa [#allocation3], 1 }

</bundles_post_ra>
